<compile_context>
chip_gen: v7x
topology: tpu7x:2x2x1
jax: 0.10.0
libtpu: 0.0.40
codegen_flags: <defaults>
</compile_context>

<pallas_src>
import jax
import jax.numpy as jnp
from jax.experimental import pallas as pl
from jax.experimental.pallas import tpu as pltpu


def local_op_kernel(x_ref, w1_ref, b1_ref, w2_ref, b2_ref, o_ref):
    # x_ref : (TB*S, D)       w1_ref: (D, C)  (bn1 scale folded in)
    # w2_ref: (C, C)  (bn2 scale folded in)   b*_ref: (1, C)     o_ref: (TB, C)
    rows, D = x_ref.shape
    TB, C = o_ref.shape
    S = rows // TB

    x = x_ref[...]                                                      # (TB*S, D)
    h = jnp.dot(x, w1_ref[...], preferred_element_type=jnp.float32)     # (TB*S, C)
    h = jnp.maximum(h + b1_ref[...], 0.0)                               # bn1 bias + relu
    h = h.astype(w2_ref.dtype)
    z = jnp.dot(h, w2_ref[...], preferred_element_type=jnp.float32)     # (TB*S, C)
    z = jnp.maximum(z + b2_ref[...], 0.0)                               # bn2 bias + relu
    o_ref[...] = jnp.max(z.reshape(TB, S, C), axis=1).astype(o_ref.dtype)  # max over S


def _choose_tb(B, s):
    """Rows-per-step: >=128 MXU rows, multiple of 8, grid >= 2 when B allows it."""
    tb = max(1, (128 + s - 1) // s)     # tb * s >= 128
    tb = ((tb + 7) // 8) * 8            # sublane-dense output blocks
    if B >= 16 and (B + tb - 1) // tb < 2:
        tb = ((max(8, (B + 1) // 2) + 7) // 8) * 8   # split batch across >=2 steps / TCs
    return tb


def local_op(x, w1, bn1, w2, bn2, eps=1e-5, tb=None):
    """x: (b, n, s, d); w1: (C, d); w2: (C, C); bn*: (gamma, beta, mean, var)."""
    b, n, s, d = x.shape
    C = w1.shape[0]
    dt = x.dtype

    def fold_bn(bn):
        gamma, beta, mean, var = bn
        scale = (gamma / jnp.sqrt(var + eps)).astype(jnp.float32)
        bias = (beta - mean * scale).astype(jnp.float32)
        return scale, bias

    s1, b1 = fold_bn(bn1)
    s2, b2 = fold_bn(bn2)

    # Fold BN scales into the conv weights (column scale on W^T); biases stay separate.
    w1t = (w1.T.astype(jnp.float32) * s1[None, :]).astype(dt)   # (d, C)
    w2t = (w2.T.astype(jnp.float32) * s2[None, :]).astype(dt)   # (C, C)
    b1 = b1.reshape(1, C)
    b2 = b2.reshape(1, C)

    B = b * n
    if tb is None:
        tb = _choose_tb(B, s)
    Bp = ((B + tb - 1) // tb) * tb

    xb = x.reshape(B, s, d)
    if Bp != B:
        xb = jnp.pad(xb, ((0, Bp - B), (0, 0), (0, 0)))   # padded rows discarded below
    xflat = xb.reshape(Bp * s, d)                          # contiguous: row = t*s + j

    out = pl.pallas_call(
        local_op_kernel,
        out_shape=jax.ShapeDtypeStruct((Bp, C), jnp.float32),
        grid_spec=pltpu.PrefetchScalarGridSpec(
            num_scalar_prefetch=0,
            grid=(Bp // tb,),
            in_specs=[
                pl.BlockSpec((tb * s, d), lambda i: (i, 0)),    # x slab (dense 2-D block)
                pl.BlockSpec((d, C), lambda i: (0, 0)),         # W1^T * bn1_scale (resident)
                pl.BlockSpec((1, C), lambda i: (0, 0)),         # bn1 bias
                pl.BlockSpec((C, C), lambda i: (0, 0)),         # W2^T * bn2_scale (resident)
                pl.BlockSpec((1, C), lambda i: (0, 0)),         # bn2 bias
            ],
            out_specs=pl.BlockSpec((tb, C), lambda i: (i, 0)),  # dense (TB, C) slab
        ),
        compiler_params=pltpu.CompilerParams(dimension_semantics=("parallel",)),
    )(xflat, w1t, b1, w2t, b2)

    out = out[:B]
    # (B, C) -> (b, n, C) -> (b, C, n)   (matches PyTorch final reshape + permute)
    return out.reshape(b, n, C).transpose(0, 2, 1)


def local_op_ref(x, w1, bn1, w2, bn2, eps=1e-5):
    """Pure-JAX reference of the same (inference-BN) computation."""
    b, n, s, d = x.shape
    C = w1.shape[0]
    g1, be1, m1, v1 = bn1
    g2, be2, m2, v2 = bn2
    xb = x.reshape(b * n, s, d)
    h = jnp.einsum("bsd,cd->bsc", xb, w1)
    h = jax.nn.relu((h - m1) / jnp.sqrt(v1 + eps) * g1 + be1)
    z = jnp.einsum("bsc,ec->bse", h, w2)
    z = jax.nn.relu((z - m2) / jnp.sqrt(v2 + eps) * g2 + be2)
    y = jnp.max(z, axis=1)                 # (b*n, C)
    return y.reshape(b, n, C).transpose(0, 2, 1)


if __name__ == "__main__":
    key = jax.random.PRNGKey(0)
    b, n, s, d, C = 2, 8, 16, 32, 64      # B = b*n = 16, TB = 8 -> grid = (2,), 128 MXU rows/step
    ks = jax.random.split(key, 11)

    x = jax.random.normal(ks[0], (b, n, s, d), jnp.float32)
    w1 = jax.random.normal(ks[1], (C, d), jnp.float32) * 0.1
    w2 = jax.random.normal(ks[2], (C, C), jnp.float32) * 0.1
    bn1 = (
        1.0 + 0.1 * jax.random.normal(ks[3], (C,), jnp.float32),            # gamma
        0.1 * jax.random.normal(ks[4], (C,), jnp.float32),                  # beta
        0.1 * jax.random.normal(ks[5], (C,), jnp.float32),                  # running_mean
        0.5 + jax.nn.softplus(jax.random.normal(ks[6], (C,), jnp.float32)), # running_var
    )
    bn2 = (
        1.0 + 0.1 * jax.random.normal(ks[7], (C,), jnp.float32),
        0.1 * jax.random.normal(ks[8], (C,), jnp.float32),
        0.1 * jax.random.normal(ks[9], (C,), jnp.float32),
        0.5 + jax.nn.softplus(jax.random.normal(ks[10], (C,), jnp.float32)),
    )

    out = jax.block_until_ready(local_op(x, w1, bn1, w2, bn2))
    assert out.shape == (b, C, n), out.shape

    ref = local_op_ref(x, w1, bn1, w2, bn2)
    assert jnp.allclose(out, ref, atol=1e-4, rtol=1e-4), float(jnp.max(jnp.abs(out - ref)))

    print("KERNEL_OK")
</pallas_src>

<mosaic_0001>
module attributes {stable_mosaic.version = 11 : i64} {
  func.func @local_op_kernel(%arg0: i32, %arg1: memref<128x32xf32, #tpu.memory_space<vmem>>, %arg2: memref<32x64xf32, #tpu.memory_space<vmem>>, %arg3: memref<1x64xf32, #tpu.memory_space<vmem>>, %arg4: memref<64x64xf32, #tpu.memory_space<vmem>>, %arg5: memref<1x64xf32, #tpu.memory_space<vmem>>, %arg6: memref<8x64xf32, #tpu.memory_space<vmem>>) attributes {dimension_semantics = [#tpu.dimension_semantics<parallel>], iteration_bounds = array<i64: 2>, scalar_prefetch = 0 : i64, scratch_operands = 0 : i64, tpu.core_type = #tpu.core_type<tc>, window_params = [{transform_indices = @transform_0, window_bounds = array<i64: 128, 32>}, {pipeline_mode = #tpu.pipeline_mode<synchronous>, transform_indices = @transform_1, window_bounds = array<i64: 32, 64>}, {pipeline_mode = #tpu.pipeline_mode<synchronous>, transform_indices = @transform_2, window_bounds = array<i64: 1, 64>}, {pipeline_mode = #tpu.pipeline_mode<synchronous>, transform_indices = @transform_3, window_bounds = array<i64: 64, 64>}, {pipeline_mode = #tpu.pipeline_mode<synchronous>, transform_indices = @transform_4, window_bounds = array<i64: 1, 64>}, {transform_indices = @transform_5, window_bounds = array<i64: 8, 64>}]} {
    %c0 = arith.constant 0 : index
    %c0_0 = arith.constant 0 : index
    %0 = vector.load %arg1[%c0, %c0_0] : memref<128x32xf32, #tpu.memory_space<vmem>>, vector<128x32xf32>
    %c0_1 = arith.constant 0 : index
    %c0_2 = arith.constant 0 : index
    %1 = vector.load %arg2[%c0_1, %c0_2] : memref<32x64xf32, #tpu.memory_space<vmem>>, vector<32x64xf32>
    %cst = arith.constant dense<0.000000e+00> : vector<128x64xf32>
    %2 = tpu.matmul %0, %1, %cst {dimension_numbers = #tpu.dot_dimension_numbers<[1], [0], [0], [1], [0, 0, 1, 1], [], []>} : vector<128x32xf32>, vector<32x64xf32>, vector<128x64xf32> -> vector<128x64xf32>
    %c0_3 = arith.constant 0 : index
    %c0_4 = arith.constant 0 : index
    %3 = vector.load %arg3[%c0_3, %c0_4] : memref<1x64xf32, #tpu.memory_space<vmem>>, vector<1x64xf32>
    %4 = vector.broadcast %3 : vector<1x64xf32> to vector<128x64xf32>
    %5 = arith.addf %2, %4 : vector<128x64xf32>
    %cst_5 = arith.constant 0.000000e+00 : f32
    %6 = vector.broadcast %cst_5 : f32 to vector<128x64xf32>
    %7 = arith.maximumf %5, %6 : vector<128x64xf32>
    %c0_6 = arith.constant 0 : index
    %c0_7 = arith.constant 0 : index
    %8 = vector.load %arg4[%c0_6, %c0_7] : memref<64x64xf32, #tpu.memory_space<vmem>>, vector<64x64xf32>
    %cst_8 = arith.constant dense<0.000000e+00> : vector<128x64xf32>
    %9 = tpu.matmul %7, %8, %cst_8 {dimension_numbers = #tpu.dot_dimension_numbers<[1], [0], [0], [1], [0, 0, 1, 1], [], []>} : vector<128x64xf32>, vector<64x64xf32>, vector<128x64xf32> -> vector<128x64xf32>
    %c0_9 = arith.constant 0 : index
    %c0_10 = arith.constant 0 : index
    %10 = vector.load %arg5[%c0_9, %c0_10] : memref<1x64xf32, #tpu.memory_space<vmem>>, vector<1x64xf32>
    %11 = vector.broadcast %10 : vector<1x64xf32> to vector<128x64xf32>
    %12 = arith.addf %9, %11 : vector<128x64xf32>
    %cst_11 = arith.constant 0.000000e+00 : f32
    %13 = vector.broadcast %cst_11 : f32 to vector<128x64xf32>
    %14 = arith.maximumf %12, %13 : vector<128x64xf32>
    %15 = vector.shape_cast %14 : vector<128x64xf32> to vector<8x16x64xf32>
    %cst_12 = arith.constant dense<0xFF800000> : vector<8x64xf32>
    %16 = vector.multi_reduction <maximumf>, %15, %cst_12 [1] : vector<8x16x64xf32> to vector<8x64xf32>
    %c0_13 = arith.constant 0 : index
    %c0_14 = arith.constant 0 : index
    %17 = vector.load %arg6[%c0_13, %c0_14] : memref<8x64xf32, #tpu.memory_space<vmem>>, vector<8x64xf32>
    tpu.vector_store %arg6[%c0_13, %c0_14], %16 {strides = array<i32>} : memref<8x64xf32, #tpu.memory_space<vmem>>, vector<8x64xf32>,
    return
  }
  func.func @transform_0(%arg0: i32) -> (i32, i32) {
    %c0_i32 = arith.constant 0 : i32
    %c0_i32_0 = arith.constant 0 : i32
    return %arg0, %c0_i32 : i32, i32
  }
  func.func @transform_1(%arg0: i32) -> (i32, i32) {
    %c0_i32 = arith.constant 0 : i32
    %c0_i32_0 = arith.constant 0 : i32
    %c0_i32_1 = arith.constant 0 : i32
    return %c0_i32, %c0_i32_0 : i32, i32
  }
  func.func @transform_2(%arg0: i32) -> (i32, i32) {
    %c0_i32 = arith.constant 0 : i32
    %c0_i32_0 = arith.constant 0 : i32
    %c0_i32_1 = arith.constant 0 : i32
    return %c0_i32, %c0_i32_0 : i32, i32
  }
  func.func @transform_3(%arg0: i32) -> (i32, i32) {
    %c0_i32 = arith.constant 0 : i32
    %c0_i32_0 = arith.constant 0 : i32
    %c0_i32_1 = arith.constant 0 : i32
    return %c0_i32, %c0_i32_0 : i32, i32
  }
  func.func @transform_4(%arg0: i32) -> (i32, i32) {
    %c0_i32 = arith.constant 0 : i32
    %c0_i32_0 = arith.constant 0 : i32
    %c0_i32_1 = arith.constant 0 : i32
    return %c0_i32, %c0_i32_0 : i32, i32
  }
  func.func @transform_5(%arg0: i32) -> (i32, i32) {
    %c0_i32 = arith.constant 0 : i32
    %c0_i32_0 = arith.constant 0 : i32
    return %arg0, %c0_i32 : i32, i32
  }
}

</mosaic_0001>

<bundles_post_ra>
// kernel: tpu_custom_call.1
= control target key start
LH: loop header
LB: loop body
LE: loop exit
PB: predicated region body
PF: predicated region fallthrough
CT: control target
= control target key end

     0   :  { %10 = vsyncpa [#allocation3], 0  ;;  %s1412_s0 = inlined_call_operand.vmem [shape: f32[256,32], index: 0, kind: input, shape index: {}]   ;;  %s1413_s1 = inlined_call_operand.vmem [shape: f32[32,64], index: 1, kind: input, shape index: {}]   ;;  %s1414_s2 = inlined_call_operand.vmem [shape: f32[1,64], index: 2, kind: input, shape index: {}]   ;;  %s1415_s3 = inlined_call_operand.vmem [shape: f32[64,64], index: 3, kind: input, shape index: {}]   ;;  %s1416_s4 = inlined_call_operand.vmem [shape: f32[1,64], index: 4, kind: input, shape index: {}]   ;;  %s1417_s5 = inlined_call_operand.hbm [shape: f32[16,64], index: 5, kind: output, shape index: {}]  }
   0x1   :  { %12 = vsyncpa [#allocation3 + $0x1], 0  ;;  %s1183_s18 = smov 0   ;;  %s1185_s19 = smov 0  }
   0x2   :  { %s1187_s20 = smov 0   ;;  %s1189_s21 = smov 0  }
   0x3 LB: > { %s1204_s22 = sadd.s32 4294967295, %s1150_s21   ;;  %s856_s23 = sadd.s32 4294967294, %s1150_s21   ;;  %s1150_s21 = sphi %s1189_s21, %s1423_s21   ;;  %s1146_s20 = sphi %s1187_s20, %s1422_s20   ;;  %s1142_s19 = sphi %s1185_s19, %s1421_s19   ;;  %s1138_s18 = sphi %s1183_s18, %s1420_s18  }
   0x4   : > { %s1208_s24 = sadd.s32 1, %s1150_s21   ;;  %s135_s25 = sadd.s32 1, %s1146_s20 }
   0x5   : > { %s132_s26 = ssub.s32 %s1150_s21, %s1208_s24  ;;  %p145_p0 = scmp.ne.s32.totalorder %s1146_s20, %s1142_s19 }
   0x6   : > { %p133_p1 = scmp.eq.s32.totalorder %s132_s26, 0  ;;  %p146_p2 = scmp.eq.s32.totalorder %s1204_s22, 1 }
   0x7   : > { %p151_p3 = scmp.ne.s32.totalorder %s1142_s19, %s1138_s18  ;;  %p152_p4 = scmp.eq.s32.totalorder %s856_s23, 1 }
   0x8   : > { %s1219_s27 = scalar_select %p133_p1, %s1146_s20, %s135_s25  }
   0x9   : > { %p1221_p5 = por %p146_p2, %p145_p0  ;;  %p1225_p6 = por %p152_p4, %p151_p3 }
   0xa   : > { %p859_p7 = scmp.ge.s32.totalorder %s1150_s21, 1  ;;  %p191_p8 = scmp.lt.s32.totalorder %s1150_s21, 3 }
   0xc   : > { %p192_p9 = pnand %p859_p7, %p191_p8 }
   0xd   : > { %v241_v0 = vld [vmem:[%s1413_s1] sm:$0xff] (!%p192_p9)  ;;  %v242_v1 = vld [vmem:[%s1413_s1 + $0x8] sm:$0xff] (!%p192_p9)  ;;  %v243_v2 = vld [vmem:[%s1413_s1 + $0x10] sm:$0xff] (!%p192_p9)  ;;  %s861_s11 = sshll.u32 (!%p192_p9), %s1204_s22, 4  ;;  %vm252_vm0 = vcmask (!%p192_p9), 261120   ;;  %vm477_vm1 = vcmask (!%p192_p9), 523264  }
   0xe   : > { %195 = sbr.rel (%p192_p9) target bundleno = 519 (0x207), region = 40  ;;  %v1017_v3 = vpack.c.bf16 (!%p192_p9), %v242_v1, %v241_v0  ;;  %v244_v4 = vld [vmem:[%s1413_s1 + $0x18] sm:$0xff] (!%p192_p9)  ;;  %p220_p10 = scmp.lt.s32.totalorder (!%p192_p9), %s861_s11, 31  ;;  %v462_v5 = vld [vmem:[%s1415_s3] sm:$0xff] (!%p192_p9)  ;;  %v463_v6 = vld [vmem:[%s1415_s3 + $0x8] sm:$0xff] (!%p192_p9)  ;;  %vm767_vm2 = vcmask (!%p192_p9), 1041409  }
   0xf   : > { %v1021_v7 = vpack.c.bf16 (!%p192_p9), %v244_v4, %v243_v2  ;;  %v1025_v8 = vpack.c.bf16 (!%p192_p9), %v463_v6, %v462_v5  ;;  %v464_v9 = vld [vmem:[%s1415_s3 + $0x10] sm:$0xff] (!%p192_p9)  ;;  %v465_v10 = vld [vmem:[%s1415_s3 + $0x18] sm:$0xff] (!%p192_p9)  ;;  %v466_v12 = vld [vmem:[%s1415_s3 + $0x20] sm:$0xff] (!%p192_p9)  ;;  %vm769_vm3 = vcmask (!%p192_p9), 1042434   ;;  %vm771_vm4 = vcmask (!%p192_p9), 1043459   ;;  %s898_s8 = sshll.u32 (!%p192_p9), %s1204_s22, 7 }
  0x10   : > { %1018 = vmatprep.subr.bf16.mxu0 (!%p192_p9), %v1017_v3  ;;  %v1029_v11 = vpack.c.bf16 (!%p192_p9), %v465_v10, %v464_v9  ;;  %v467_v13 = vld [vmem:[%s1415_s3 + $0x28] sm:$0xff] (!%p192_p9)  ;;  %v468_v31 = vld [vmem:[%s1415_s3 + $0x30] sm:$0xff] (!%p192_p9)  ;;  %v469_v32 = vld [vmem:[%s1415_s3 + $0x38] sm:$0xff] (!%p192_p9)  ;;  %vm773_vm5 = vcmask (!%p192_p9), 1044484   ;;  %vm775_vm6 = vcmask (!%p192_p9), 1045509   ;;  %vm777_vm7 = vcmask (!%p192_p9), 1046534  }
  0x11   : > { %1020 = vmatpush3.bf16.msra.mxu0 (!%p192_p9), %v1017_v3  ;;  %1041 = vmatprep.subr.bf16.mxu1 (!%p192_p9), %v1025_v8  ;;  %v1033_v16 = vpack.c.bf16 (!%p192_p9), %v467_v13, %v466_v12  ;;  %v1037_v33 = vpack.c.bf16 (!%p192_p9), %v469_v32, %v468_v31  ;;  %v863_v34 = vld [vmem:[%s1414_s2] ss:$0 sm:$0xff] (!%p192_p9)  ;;  %vm779_vm8 = vcmask (!%p192_p9), 1047559   ;;  %s1152_s22 = smov (!%p192_p9), [#allocation2]  }
  0x12   : > { %1022 = vmatprep.subr.bf16.mxu0 (!%p192_p9), %v1021_v7  ;;  %1045 = vmatpush3.bf16.msra.mxu1 (!%p192_p9), %v1025_v8  ;;  %s1092_s16 = sshll.u32 (!%p192_p9), %s1152_s22, 4  ;;  %s1093_s16 = int_to_ptr.vmem [resolvable:$false] %s1092_s16 }
  0x13   : > { %1042 = vmatprep.subr.bf16.mxu1 (!%p192_p9), %v1029_v11  ;;  %s1094_s17 = scalar_lea.vmem (!%p192_p9), %s1093_s16, 256 }
  0x15   : > { %s1425_s11 = smov (!%p220_p10, %s861_s11), 31  ;;  %1024 = vmatpush3.bf16.msra.mxu0 %v1021_v7 }
  0x16   : > { %s862_s6 = sshll.u32 %s1425_s11, 3  ;;  %1026 = vmatprep.subr.bf16.mxu0 %v1025_v8  ;;  %1046 = vmatpush3.bf16.msra.mxu1 %v1029_v11 }
  0x17   : > { %s1265_s14 = scalar_lea.vmem %s1412_s0, %s862_s6  ;;  %1043 = vmatprep.subr.bf16.mxu1 %v1033_v16  ;;  %s216_s6 = sand.u32 1, %s1142_s19  }
  0x18   : > { %v225_v14 = vld [vmem:[%s1265_s14] sm:$0xff]  ;;  %v226_v15 = vld [vmem:[%s1265_s14 + $0x8] sm:$0xff]  ;;  %v227_v17 = vld [vmem:[%s1265_s14 + $0x10] sm:$0xff]  ;;  %s860_s7 = sshll.u32 %s216_s6, 3  ;;  %s784_s11 = scalar_lea.sflag [#allocation3], %s216_s6 }
  0x19   : > { %953 = vmatprep.mubr.msk.f32.mxu0 %vm252_vm0, %v225_v14  ;;  %v228_v18 = vld [vmem:[%s1265_s14 + $0x18] sm:$0xff]  ;;  %v229_v19 = vld [vmem:[%s1265_s14 + $0x20] sm:$0xff]  ;;  %v230_v20 = vld [vmem:[%s1265_s14 + $0x28] sm:$0xff]  ;;  %s218_s9 = scalar_lea.vmem [#allocation2], %s860_s7 }
  0x1a   : > { %954 = vmatmul.mubr.msk.f32.vlgmr.msra.gmra.mrb[0].mxu0 %vm252_vm0, %v226_v15  ;;  %1047 = vmatpush3.bf16.msra.mxu1 %v1033_v16  ;;  %v231_v21 = vld [vmem:[%s1265_s14 + $0x30] sm:$0xff]  ;;  %v232_v22 = vld [vmem:[%s1265_s14 + $0x38] sm:$0xff]  ;;  %v233_v23 = vld [vmem:[%s1265_s14 + $0x40] sm:$0xff]  ;;  %s797_s10 = sshll.u32 %s218_s9, 4  ;;  %s1371_s10 = int_to_ptr.vmem [resolvable:$true] %s797_s10 }
  0x1b   : > { %956 = vmatprep.mubr.msk.f32.mxu0 %vm252_vm0, %v227_v17  ;;  %1028 = vmatpush3.bf16.msra.mxu0 %v1025_v8  ;;  %v234_v24 = vld [vmem:[%s1265_s14 + $0x48] sm:$0xff]  ;;  %v235_v25 = vld [vmem:[%s1265_s14 + $0x50] sm:$0xff]  ;;  %v236_v26 = vld [vmem:[%s1265_s14 + $0x58] sm:$0xff]  ;;  %s1088_s15 = scalar_lea.vmem %s1371_s10, 128  ;;  %p1095_p0 = scmp.lt.s32.totalorder %s1371_s10, %s1093_s16 }
  0x1c   : > { %1030 = vmatprep.subr.bf16.mxu0 %v1029_v11  ;;  %v237_v27 = vld [vmem:[%s1265_s14 + $0x60] sm:$0xff]  ;;  %v238_v28 = vld [vmem:[%s1265_s14 + $0x68] sm:$0xff]  ;;  %v239_v29 = vld [vmem:[%s1265_s14 + $0x70] sm:$0xff]  ;;  %1044 = vmatprep.subr.bf16.mxu1 %v1037_v33  ;;  %p1089_p11 = scmp.ne.s32.totalorder %s1371_s10, %s1088_s15  ;;  %p1096_p1 = scmp.lt.s32.totalorder %s1094_s17, %s1088_s15 }
  0x1d   : > { %v240_v30 = vld [vmem:[%s1265_s14 + $0x78] sm:$0xff]  ;;  %s1369_s14 = scalar_lea.hbm %s1417_s5, %s898_s8 }
  0x1e   : > { %957 = vmatmul.mubr.msk.f32.gmra.mrb[2].mxu0 %vm252_vm0, %v228_v18  ;;  %1048 = vmatpush3.bf16.msra.mxu1 %v1037_v33  ;;  %p1090_p12 = pnand %p1089_p11, %p1221_p5  ;;  %p1097_p2 = por %p1096_p1, %p1095_p0 }
  0x1f   : > { %959 = vmatprep.mubr.msk.f32.mxu0 %vm252_vm0, %v229_v19  ;;  %1032 = vmatpush3.bf16.msra.mxu0 %v1029_v11  ;;  %v1327_v19 = vld [vmem:[%s1416_s4] ss:$0 sm:$0xff] }
  0x20   : > { %1034 = vmatprep.subr.bf16.mxu0 %v1033_v16  ;;  %p1091_p13 = pneg %p1090_p12 }
  0x22   : > { %960 = vmatmul.mubr.msk.f32.gmra.mrb[4].mxu0 %vm252_vm0, %v230_v20  ;;  %p1098_p3 = pnand %p1097_p2, %p1091_p13 }
  0x23   : > { %962 = vmatprep.mubr.msk.f32.mxu0 %vm252_vm0, %v231_v21  ;;  %1036 = vmatpush3.bf16.msra.mxu0 %v1033_v16 }
  0x24   : > { %1038 = vmatprep.subr.bf16.mxu0 %v1037_v33 }
  0x26   : > { %963 = vmatmul.mubr.msk.f32.gmra.mrb[6].mxu0 %vm252_vm0, %v232_v22 }
  0x27   : > { %965 = vmatprep.mubr.msk.f32.mxu0 %vm252_vm0, %v233_v23  ;;  %1040 = vmatpush3.bf16.msra.mxu0 %v1037_v33 }
  0x2a   : > { %966 = vmatmul.mubr.msk.f32.gmra.mrb[8].mxu0 %vm252_vm0, %v234_v24 }
  0x2b   : > { %968 = vmatprep.mubr.msk.f32.mxu0 %vm252_vm0, %v235_v25 }
  0x2e   : > { %969 = vmatmul.mubr.msk.f32.gmra.mrb[10].mxu0 %vm252_vm0, %v236_v26 }
  0x2f   : > { %971 = vmatprep.mubr.msk.f32.mxu0 %vm252_vm0, %v237_v27 }
  0x32   : > { %972 = vmatmul.mubr.msk.f32.gmra.mrb[12].mxu0 %vm252_vm0, %v238_v28 }
  0x33   : > { %974 = vmatprep.mubr.msk.f32.mxu0 %vm252_vm0, %v239_v29 }
  0x36   : > { %975 = vmatmul.mubr.msk.f32.gmra.mrb[14].mxu0 %vm252_vm0, %v240_v30 }
  0xed   : > { %v955_v35 = vpop.f32.mrb[0].mxu0 }
  0xee   : > { %v373_v36 = vadd.f32 %v955_v35, %v863_v34  ;;  %v367_v37 = vpop.f32.mrb[1].mxu0 }
  0xef   : > { %v368_v38 = vadd.f32 %v863_v34, %v367_v37 }
  0xf0   : > { %v447_v41 = vmax.f32 %v373_v36, 0.0 }
  0xf1   : > { %v446_v39 = vmax.f32 %v368_v38, 0.0  ;;  %v958_v40 = vpop.f32.mrb[2].mxu0 }
  0xf2   : > { %v383_v42 = vadd.f32 %v958_v40, %v863_v34  ;;  %v377_v43 = vpop.f32.mrb[3].mxu0 }
  0xf3   : > { %v378_v44 = vadd.f32 %v863_v34, %v377_v43  ;;  %993 = vmatprep.mubr.msk.f32.mxu0 %vm477_vm1, %v446_v39 }
  0xf4   : > { %994 = vmatmul.mubr.msk.f32.vlgmr.msra.gmra.mrb[16].mxu0 %vm477_vm1, %v447_v41  ;;  %v449_v47 = vmax.f32 %v383_v42, 0.0 }
  0xf5   : > { %v448_v45 = vmax.f32 %v378_v44, 0.0  ;;  %v961_v46 = vpop.f32.mrb[4].mxu0 }
  0xf6   : > { %v393_v48 = vadd.f32 %v961_v46, %v863_v34  ;;  %v387_v49 = vpop.f32.mrb[5].mxu0 }
  0xf7   : > { %v388_v50 = vadd.f32 %v863_v34, %v387_v49  ;;  %996 = vmatprep.mubr.msk.f32.mxu1 %vm477_vm1, %v448_v45 }
  0xf8   : > { %997 = vmatmul.mubr.msk.f32.vlgmr.msra.gmra.mrb[0].mxu1 %vm477_vm1, %v449_v47  ;;  %v451_v53 = vmax.f32 %v393_v48, 0.0 }
  0xf9   : > { %v450_v51 = vmax.f32 %v388_v50, 0.0  ;;  %v964_v52 = vpop.f32.mrb[6].mxu0 }
  0xfa   : > { %v403_v54 = vadd.f32 %v964_v52, %v863_v34  ;;  %v397_v55 = vpop.f32.mrb[7].mxu0 }
  0xfb   : > { %v398_v56 = vadd.f32 %v863_v34, %v397_v55  ;;  %999 = vmatprep.mubr.msk.f32.mxu1 %vm477_vm1, %v450_v51 }
  0xfc   : > { %1000 = vmatmul.mubr.msk.f32.gmra.mrb[2].mxu1 %vm477_vm1, %v451_v53  ;;  %v453_v59 = vmax.f32 %v403_v54, 0.0 }
  0xfd   : > { %v452_v57 = vmax.f32 %v398_v56, 0.0  ;;  %v967_v58 = vpop.f32.mrb[8].mxu0 }
  0xfe   : > { %v413_v60 = vadd.f32 %v967_v58, %v863_v34  ;;  %v407_v61 = vpop.f32.mrb[9].mxu0 }
  0xff   : > { %v408_v62 = vadd.f32 %v863_v34, %v407_v61  ;;  %1002 = vmatprep.mubr.msk.f32.mxu1 %vm477_vm1, %v452_v57 }
 0x100   : > { %1003 = vmatmul.mubr.msk.f32.gmra.mrb[4].mxu1 %vm477_vm1, %v453_v59  ;;  %v455_v1 = vmax.f32 %v413_v60, 0.0 }
 0x101   : > { %v454_v63 = vmax.f32 %v408_v62, 0.0  ;;  %v970_v0 = vpop.f32.mrb[10].mxu0 }
 0x102   : > { %v423_v2 = vadd.f32 %v970_v0, %v863_v34  ;;  %v417_v3 = vpop.f32.mrb[11].mxu0 }
 0x103   : > { %v418_v4 = vadd.f32 %v863_v34, %v417_v3  ;;  %1005 = vmatprep.mubr.msk.f32.mxu1 %vm477_vm1, %v454_v63 }
 0x104   : > { %1006 = vmatmul.mubr.msk.f32.gmra.mrb[6].mxu1 %vm477_vm1, %v455_v1  ;;  %v457_v7 = vmax.f32 %v423_v2, 0.0 }
 0x105   : > { %v456_v5 = vmax.f32 %v418_v4, 0.0  ;;  %v973_v6 = vpop.f32.mrb[12].mxu0 }
 0x106   : > { %v433_v8 = vadd.f32 %v973_v6, %v863_v34  ;;  %v427_v9 = vpop.f32.mrb[13].mxu0 }
 0x107   : > { %v428_v10 = vadd.f32 %v863_v34, %v427_v9  ;;  %1008 = vmatprep.mubr.msk.f32.mxu1 %vm477_vm1, %v456_v5 }
 0x108   : > { %1009 = vmatmul.mubr.msk.f32.gmra.mrb[8].mxu1 %vm477_vm1, %v457_v7  ;;  %v459_v13 = vmax.f32 %v433_v8, 0.0 }
 0x109   : > { %v458_v11 = vmax.f32 %v428_v10, 0.0  ;;  %v976_v12 = vpop.f32.mrb[14].mxu0 }
 0x10a   : > { %v443_v14 = vadd.f32 %v976_v12, %v863_v34  ;;  %v437_v15 = vpop.f32.mrb[15].mxu0 }
 0x10b   : > { %v438_v16 = vadd.f32 %v863_v34, %v437_v15  ;;  %1011 = vmatprep.mubr.msk.f32.mxu1 %vm477_vm1, %v458_v11 }
 0x10c   : > { %1012 = vmatmul.mubr.msk.f32.gmra.mrb[10].mxu1 %vm477_vm1, %v459_v13  ;;  %v461_v18 = vmax.f32 %v443_v14, 0.0 }
 0x10d   : > { %v460_v17 = vmax.f32 %v438_v16, 0.0 }
 0x10f   : > { %1014 = vmatprep.mubr.msk.f32.mxu1 %vm477_vm1, %v460_v17 }
 0x110   : > { %1015 = vmatmul.mubr.msk.f32.gmra.mrb[12].mxu1 %vm477_vm1, %v461_v18 }
 0x1c7   : > { %v995_v20 = vpop.f32.mrb[16].mxu0 }
 0x1c8   : > { %v598_v21 = vadd.f32 %v995_v20, %v1327_v19  ;;  %v592_v22 = vpop.f32.mrb[17].mxu0 }
 0x1c9   : > { %v593_v23 = vadd.f32 %v1327_v19, %v592_v22 }
 0x1ca   : > { %v672_v24 = vmax.f32 %v598_v21, 0.0 }
 0x1cb   : > { %v671_v25 = vmax.f32 %v593_v23, 0.0  ;;  %v998_v26 = vpop.f32.mrb[0].mxu1 }
 0x1cc   : > { %v688_v27 = vsel %vm477_vm1, %v672_v24, -inf  ;;  %v608_v28 = vadd.f32 %v998_v26, %v1327_v19  ;;  %v602_v29 = vpop.f32.mrb[1].mxu1 }
 0x1cd   : > { %v687_v30 = vsel %vm477_vm1, %v671_v25, -inf  ;;  %v603_v31 = vadd.f32 %v1327_v19, %v602_v29 }
 0x1ce   : > { %v689_v32 = vmax.f32 %v687_v30, %v688_v27  ;;  %v674_v33 = vmax.f32 %v608_v28, 0.0 }
 0x1cf   : > { %v673_v34 = vmax.f32 %v603_v31, 0.0  ;;  %v1001_v35 = vpop.f32.mrb[2].mxu1 }
 0x1d0   : > { %v690_v36 = vrot.slane %v689_v32, 4  ;;  %v697_v37 = vsel %vm477_vm1, %v674_v33, -inf  ;;  %v618_v38 = vadd.f32 %v1001_v35, %v1327_v19  ;;  %v612_v39 = vpop.f32.mrb[3].mxu1 }
 0x1d1   : > { %v696_v40 = vsel %vm477_vm1, %v673_v34, -inf  ;;  %v613_v41 = vadd.f32 %v1327_v19, %v612_v39 }
 0x1d2   : > { %v691_v42 = vmax.f32 %v689_v32, %v690_v36  ;;  %v698_v43 = vmax.f32 %v696_v40, %v697_v37  ;;  %v676_v44 = vmax.f32 %v618_v38, 0.0 }
 0x1d3   : > { %v675_v45 = vmax.f32 %v613_v41, 0.0  ;;  %v1004_v46 = vpop.f32.mrb[4].mxu1 }
 0x1d4   : > { %v692_v47 = vrot.slane %v691_v42, 2  ;;  %v699_v48 = vrot.slane %v698_v43, 4  ;;  %v706_v49 = vsel %vm477_vm1, %v676_v44, -inf  ;;  %v628_v50 = vadd.f32 %v1004_v46, %v1327_v19  ;;  %v622_v51 = vpop.f32.mrb[5].mxu1 }
 0x1d5   : > { %v705_v52 = vsel %vm477_vm1, %v675_v45, -inf  ;;  %v623_v53 = vadd.f32 %v1327_v19, %v622_v51 }
 0x1d6   : > { %v693_v54 = vmax.f32 %v691_v42, %v692_v47  ;;  %v700_v55 = vmax.f32 %v698_v43, %v699_v48  ;;  %v707_v56 = vmax.f32 %v705_v52, %v706_v49  ;;  %v678_v57 = vmax.f32 %v628_v50, 0.0 }
 0x1d7   : > { %v677_v58 = vmax.f32 %v623_v53, 0.0  ;;  %v1007_v59 = vpop.f32.mrb[6].mxu1 }
 0x1d8   : > { %v701_v60 = vrot.slane %v700_v55, 2  ;;  %v708_v61 = vrot.slane %v707_v56, 4  ;;  %v715_v62 = vsel %vm477_vm1, %v678_v57, -inf  ;;  %v632_v63 = vpop.f32.mrb[7].mxu1  ;;  %v694_v0 = vrot.slane %v693_v54, 1 }
 0x1d9   : > { %v714_v1 = vsel %vm477_vm1, %v677_v58, -inf  ;;  %v638_v2 = vadd.f32 %v1007_v59, %v1327_v19  ;;  %v633_v3 = vadd.f32 %v1327_v19, %v632_v63 }
 0x1da   : > { %v702_v4 = vmax.f32 %v700_v55, %v701_v60  ;;  %v709_v5 = vmax.f32 %v707_v56, %v708_v61  ;;  %v716_v6 = vmax.f32 %v714_v1, %v715_v62  ;;  %v695_v15 = vmax.f32 %v693_v54, %v694_v0 }
 0x1db   : > { %v680_v7 = vmax.f32 %v638_v2, 0.0  ;;  %v679_v8 = vmax.f32 %v633_v3, 0.0  ;;  %v1010_v9 = vpop.f32.mrb[8].mxu1 }
 0x1dc   : > { %v703_v10 = vrot.slane %v702_v4, 1  ;;  %v710_v11 = vrot.slane %v709_v5, 2  ;;  %v717_v12 = vrot.slane %v716_v6, 4  ;;  %v648_v13 = vadd.f32 %v1010_v9, %v1327_v19  ;;  %v642_v14 = vpop.f32.mrb[9].mxu1 }
 0x1dd   : > { %v724_v16 = vsel %vm477_vm1, %v680_v7, -inf  ;;  %v723_v17 = vsel %vm477_vm1, %v679_v8, -inf  ;;  %v643_v18 = vadd.f32 %v1327_v19, %v642_v14 }
 0x1de   : > { %v704_v20 = vmax.f32 %v702_v4, %v703_v10  ;;  %v711_v21 = vmax.f32 %v709_v5, %v710_v11  ;;  %v718_v22 = vmax.f32 %v716_v6, %v717_v12  ;;  %v725_v23 = vmax.f32 %v723_v17, %v724_v16 }
 0x1df   : > { %v682_v24 = vmax.f32 %v648_v13, 0.0  ;;  %v681_v25 = vmax.f32 %v643_v18, 0.0  ;;  %v1013_v26 = vpop.f32.mrb[10].mxu1 }
 0x1e0   : > { %v768_v27 = vsel %vm767_vm2, %v704_v20, %v695_v15  ;;  %v712_v28 = vrot.slane %v711_v21, 1  ;;  %v719_v29 = vrot.slane %v718_v22, 2  ;;  %v726_v30 = vrot.slane %v725_v23, 4  ;;  %v652_v31 = vpop.f32.mrb[11].mxu1 }
 0x1e1   : > { %v733_v32 = vsel %vm477_vm1, %v682_v24, -inf  ;;  %v732_v33 = vsel %vm477_vm1, %v681_v25, -inf  ;;  %v658_v34 = vadd.f32 %v1013_v26, %v1327_v19  ;;  %v653_v35 = vadd.f32 %v1327_v19, %v652_v31 }
 0x1e2   : > { %v713_v36 = vmax.f32 %v711_v21, %v712_v28  ;;  %v720_v37 = vmax.f32 %v718_v22, %v719_v29  ;;  %v727_v38 = vmax.f32 %v725_v23, %v726_v30  ;;  %v734_v39 = vmax.f32 %v732_v33, %v733_v32 }
 0x1e3   : > { %v684_v40 = vmax.f32 %v658_v34, 0.0  ;;  %v683_v41 = vmax.f32 %v653_v35, 0.0  ;;  %v1016_v42 = vpop.f32.mrb[12].mxu1 }
 0x1e4   : > { %v770_v43 = vsel %vm769_vm3, %v713_v36, %v768_v27  ;;  %v721_v44 = vrot.slane %v720_v37, 1  ;;  %v728_v45 = vrot.slane %v727_v38, 2  ;;  %v735_v46 = vrot.slane %v734_v39, 4  ;;  %v662_v47 = vpop.f32.mrb[13].mxu1 }
 0x1e5   : > { %v742_v48 = vsel %vm477_vm1, %v684_v40, -inf  ;;  %v741_v49 = vsel %vm477_vm1, %v683_v41, -inf  ;;  %v668_v50 = vadd.f32 %v1016_v42, %v1327_v19  ;;  %v663_v51 = vadd.f32 %v1327_v19, %v662_v47 }
 0x1e6   : > { %v722_v52 = vmax.f32 %v720_v37, %v721_v44  ;;  %v729_v53 = vmax.f32 %v727_v38, %v728_v45  ;;  %v736_v54 = vmax.f32 %v734_v39, %v735_v46  ;;  %v743_v55 = vmax.f32 %v741_v49, %v742_v48 }
 0x1e7   : > { %v686_v56 = vmax.f32 %v668_v50, 0.0  ;;  %v685_v57 = vmax.f32 %v663_v51, 0.0 }
 0x1e8   : > { %v772_v58 = vsel %vm771_vm4, %v722_v52, %v770_v43  ;;  %v730_v59 = vrot.slane %v729_v53, 1  ;;  %v737_v60 = vrot.slane %v736_v54, 2  ;;  %v744_v61 = vrot.slane %v743_v55, 4 }
 0x1e9   : > { %v751_v62 = vsel %vm477_vm1, %v686_v56, -inf  ;;  %v750_v63 = vsel %vm477_vm1, %v685_v57, -inf }
 0x1ea   : > { %v731_v0 = vmax.f32 %v729_v53, %v730_v59  ;;  %v738_v1 = vmax.f32 %v736_v54, %v737_v60  ;;  %v745_v19 = vmax.f32 %v743_v55, %v744_v61  ;;  %v752_v2 = vmax.f32 %v750_v63, %v751_v62 }
 0x1ec   : > { %v739_v3 = vrot.slane %v738_v1, 1  ;;  %v746_v4 = vrot.slane %v745_v19, 2  ;;  %v753_v5 = vrot.slane %v752_v2, 4  ;;  %v774_v6 = vsel %vm773_vm5, %v731_v0, %v772_v58 }
 0x1ee   : > { %v740_v7 = vmax.f32 %v738_v1, %v739_v3  ;;  %v747_v8 = vmax.f32 %v745_v19, %v746_v4  ;;  %v754_v9 = vmax.f32 %v752_v2, %v753_v5 }
 0x1f0   : > { %v748_v10 = vrot.slane %v747_v8, 1  ;;  %v755_v11 = vrot.slane %v754_v9, 2  ;;  %v776_v12 = vsel %vm775_vm6, %v740_v7, %v774_v6 }
 0x1f2   : > { %v749_v13 = vmax.f32 %v747_v8, %v748_v10  ;;  %v756_v14 = vmax.f32 %v754_v9, %v755_v11 }
 0x1f4   : > { %v757_v15 = vrot.slane %v756_v14, 1  ;;  %v778_v16 = vsel %vm777_vm7, %v749_v13, %v776_v12 }
 0x1f6   : > { %v758_v17 = vmax.f32 %v756_v14, %v757_v15 }
 0x1f8   : > { %v780_v18 = vsel %vm779_vm8, %v758_v17, %v778_v16 }
 0x1f9   : > { %782 = vst.msk [vmem:[%s218_s9] sm:$0xff] %vm477_vm1, %v780_v18 }
 0x1fa   : > { %1101 = shalt.err (!%p1098_p3)
}
 0x1fb   : > { %s1102_s23 = scalar_lea.hbm %s1369_s14, 128  ;;  %s1106_s30 = scalar_lea.hbm %s1417_s5, 256 }
 0x1fc   : > { %p1103_p4 = scmp.ne.s32.totalorder %s1369_s14, %s1102_s23  ;;  %p1107_p9 = scmp.lt.u32.totalorder %s1369_s14, %s1417_s5 }
 0x1fd   : > { %p1108_p10 = scmp.lt.u32.totalorder %s1106_s30, %s1102_s23  ;;  %p1110_p12 = scmp.lt.u32.totalorder %s1102_s23, %s1369_s14 }
 0x1fe   : > { %p1104_p7 = pnand %p1103_p4, %p1221_p5 }
 0x1ff   : > { %p1109_p11 = por %p1108_p10, %p1107_p9 }
 0x200   : > { %p1105_p8 = pneg %p1104_p7 }
 0x201   : > { %p1111_p13 = por %p1110_p12, %p1109_p11 }
 0x203   : > { %p1112_p0 = pnand %p1111_p13, %p1105_p8 }
 0x205   : > { %1115 = shalt.err (!%p1112_p0)
}
 0x206   : > { %1049 = dma.vmem_to_hbm [thread:$0]  (%p1221_p5), %s1371_s10, 128, %s1369_s14, %s784_s11  }
 0x207 PF: > { %p1055_p1 = scmp.ge.s32.totalorder %s1150_s21, 2  ;;  %s809_s8 = sand.u32 1, %s1138_s18  }
 0x208   : > { %s810_s9 = scalar_lea.sflag [#allocation3], %s809_s8 }
 0x209   : > { %p1052_p2 = pnand %p1055_p1, %p1225_p6 }
 0x20b   : > { %1133 = dma.done.wait (!%p1052_p2), %s810_s9, 128  }
 0x20c   : > { %1135 = vsyncadd (!%p1052_p2), %s810_s9, 4294967168  ;;  %p15_p3 = scmp.ge.s32.totalorder %s1208_s24, 4   ;;  %s1420_s18 = smov %s1142_s19 }
 0x20d   : > { %s1421_s19 = smov %s1146_s20  ;;  %s1422_s20 = smov %s1219_s27 }
 0x20e   : > { %s1423_s21 = smov %s1208_s24  ;;  %17 = sbr.rel (!%p15_p3) target bundleno = 3 (0x3), region = 75 }
 0x215   :  { %815 = vsyncpa [#allocation3], 1 }
 0x216   :  { %817 = vsyncpa [#allocation3 + $0x1], 1 }

</bundles_post_ra>
